<compile_context>
chip_gen: v7x
topology: tpu7x:2x2x1
jax: 0.10.0
libtpu: 0.0.40
codegen_flags: <defaults>
</compile_context>

<pallas_src>
import functools

import jax
import jax.numpy as jnp
from jax.experimental import pallas as pl
from jax.experimental.pallas import tpu as pltpu

EPS = 1e-5  # nn.LayerNorm default


def _layer_norm(x, gamma, beta):
    mu = jnp.mean(x, axis=-1, keepdims=True)
    var = jnp.mean((x - mu) ** 2, axis=-1, keepdims=True)
    return (x - mu) * jax.lax.rsqrt(var + EPS) * gamma + beta


# ---------------------------------------------------------------------------
# Fused transformer-stack kernel (all blocks + final LN + head)
# ---------------------------------------------------------------------------
def transformer_stack_kernel(x_ref, wqkv_ref, wp_ref, bp_ref,
                             ln1g_ref, ln1b_ref, ln2g_ref, ln2b_ref,
                             w1_ref, b1_ref, w2_ref, b2_ref,
                             lnfg_ref, lnfb_ref, wh_ref, bh_ref,
                             logits_ref, x_vmem,
                             *, n_heads, batch):
    BT, E = x_vmem.shape
    B = batch
    T = BT // B
    H = n_heads
    hs = E // H
    layer = pl.program_id(0)

    # Load the embeddings into the resident VMEM activation on the first layer.
    @pl.when(layer == 0)
    def _():
        x_vmem[...] = x_ref[...]

    x = x_vmem[...]                                          # (B*T, E) f32

    # ---- LayerNorm 1 (f32 VPU math) ----
    z1 = _layer_norm(x, ln1g_ref[0], ln1b_ref[0])            # (B*T, E)

    # ---- fused QKV projection: one (B*T,E) @ (E,3E) MXU pass ----
    qkv = jnp.dot(z1.astype(jnp.bfloat16), wqkv_ref[0],
                  preferred_element_type=jnp.float32)        # (B*T, 3E) f32
    k = qkv[:, :E].astype(jnp.bfloat16)
    q = (qkv[:, E:2 * E] * (hs ** -0.5)).astype(jnp.bfloat16)  # scale folded once
    v = qkv[:, 2 * E:].astype(jnp.bfloat16)

    # causal mask (col <= row), broadcast over the batch
    rows = jax.lax.broadcasted_iota(jnp.int32, (B, T, T), 1)
    cols = jax.lax.broadcasted_iota(jnp.int32, (B, T, T), 2)
    causal = cols <= rows

    head_outs = []
    for h in range(H):                                       # static; tiny H
        kh = k[:, h * hs:(h + 1) * hs].reshape(B, T, hs)
        qh = q[:, h * hs:(h + 1) * hs].reshape(B, T, hs)
        vh = v[:, h * hs:(h + 1) * hs].reshape(B, T, hs)
        # wei[b,t,s] = sum_d kh[b,t,d] * qh[b,s,d]   (K @ Q^T, as in reference)
        wei = jnp.einsum("btd,bsd->bts", kh, qh,
                         preferred_element_type=jnp.float32)
        wei = jnp.where(causal, wei, -jnp.inf)
        wei = jax.nn.softmax(wei, axis=-1)                   # f32 softmax
        oh = jnp.einsum("bts,bsd->btd", wei.astype(jnp.bfloat16), vh,
                        preferred_element_type=jnp.float32)  # (B, T, hs)
        head_outs.append(oh.reshape(BT, hs))
    attn = jnp.concatenate(head_outs, axis=-1)               # (B*T, E)

    attn = jnp.dot(attn.astype(jnp.bfloat16), wp_ref[0],
                   preferred_element_type=jnp.float32) + bp_ref[0]
    z = z1 + attn                                            # residual #1

    # ---- LayerNorm 2 + feed-forward ----
    z2 = _layer_norm(z, ln2g_ref[0], ln2b_ref[0])
    h1 = jnp.dot(z2.astype(jnp.bfloat16), w1_ref[0],
                 preferred_element_type=jnp.float32) + b1_ref[0]
    h1 = jnp.maximum(h1, 0.0)
    ff = jnp.dot(h1.astype(jnp.bfloat16), w2_ref[0],
                 preferred_element_type=jnp.float32) + b2_ref[0]
    new_x = z2 + ff                                          # residual #2 (matches ref)
    x_vmem[...] = new_x

    # ---- final LayerNorm + model head, fused on the last layer ----
    @pl.when(layer == pl.num_programs(0) - 1)
    def _():
        zf = _layer_norm(new_x, lnfg_ref[...], lnfb_ref[...])
        logits = jnp.dot(zf.astype(jnp.bfloat16), wh_ref[...],
                         preferred_element_type=jnp.float32) + bh_ref[...]
        logits_ref[...] = logits.astype(logits_ref.dtype)    # (B*T, Vpad) lane-dense


# ---------------------------------------------------------------------------
# Wrapper
# ---------------------------------------------------------------------------
def transformer_forward(tokens, params):
    """Pallas-backed forward pass. Returns logits of shape (B, T, vocab)."""
    B, T = tokens.shape
    E = params["tok_emb"].shape[1]
    V = params["vocab_size"]
    Vp = params["w_head"].shape[1]
    L = params["wqkv"].shape[0]
    H = params["n_heads"]

    # token + position embeddings (gather stays in plain XLA)
    x = params["tok_emb"][tokens] + params["pos_emb"][jnp.arange(T)][None]
    x = x.astype(jnp.float32).reshape(B * T, E)     # fold B into the matmul M dim

    def layer_spec(arr):
        shape = arr.shape
        nd = len(shape)
        return pl.BlockSpec((1,) + shape[1:],
                            lambda l, _nd=nd: (l,) + (0,) * (_nd - 1))

    def const_spec(arr):
        nd = arr.ndim
        return pl.BlockSpec(arr.shape, lambda l, _nd=nd: (0,) * _nd)

    kernel = functools.partial(transformer_stack_kernel, n_heads=H, batch=B)
    logits = pl.pallas_call(
        kernel,
        out_shape=jax.ShapeDtypeStruct((B * T, Vp), jnp.float32),
        grid=(L,),
        in_specs=[
            const_spec(x),                                   # embeddings (resident)
            layer_spec(params["wqkv"]), layer_spec(params["wp"]),
            layer_spec(params["bp"]),
            layer_spec(params["ln1g"]), layer_spec(params["ln1b"]),
            layer_spec(params["ln2g"]), layer_spec(params["ln2b"]),
            layer_spec(params["w1"]), layer_spec(params["b1"]),
            layer_spec(params["w2"]), layer_spec(params["b2"]),
            const_spec(params["lnf_g"]), const_spec(params["lnf_b"]),
            const_spec(params["w_head"]), const_spec(params["b_head"]),
        ],
        out_specs=pl.BlockSpec((B * T, Vp), lambda l: (0, 0)),
        scratch_shapes=[pltpu.VMEM((B * T, E), jnp.float32)],  # resident activation
        compiler_params=pltpu.CompilerParams(
            dimension_semantics=("arbitrary",)),             # layer axis is sequential
    )(x, params["wqkv"], params["wp"], params["bp"],
      params["ln1g"], params["ln1b"], params["ln2g"], params["ln2b"],
      params["w1"], params["b1"], params["w2"], params["b2"],
      params["lnf_g"], params["lnf_b"], params["w_head"], params["b_head"])

    return logits.reshape(B, T, Vp)[:, :, :V]


# ---------------------------------------------------------------------------
# Pure-JAX reference (same math & same bf16-matmul/f32-accumulate policy)
# ---------------------------------------------------------------------------
def reference_forward(tokens, params):
    B, T = tokens.shape
    E = params["tok_emb"].shape[1]
    H = params["n_heads"]
    hs = E // H
    V = params["vocab_size"]
    L = params["wqkv"].shape[0]

    def mm(a, w):  # bf16 operands, f32 accumulation (same policy as the kernel)
        return jnp.dot(a.astype(jnp.bfloat16), w.astype(jnp.bfloat16),
                       preferred_element_type=jnp.float32)

    x = (params["tok_emb"][tokens] + params["pos_emb"][jnp.arange(T)][None]
         ).astype(jnp.float32)
    causal = jnp.arange(T)[None, :] <= jnp.arange(T)[:, None]     # col <= row

    for l in range(L):
        z1 = _layer_norm(x, params["ln1g"][l], params["ln1b"][l])
        wqkv = params["wqkv"][l]
        outs = []
        for h in range(H):                                  # per-head, as in PyTorch
            wk = wqkv[:, h * hs:(h + 1) * hs]
            wq = wqkv[:, E + h * hs:E + (h + 1) * hs]
            wv = wqkv[:, 2 * E + h * hs:2 * E + (h + 1) * hs]
            k = mm(z1, wk)
            q = mm(z1, wq) * (hs ** -0.5)
            v = mm(z1, wv)
            wei = jnp.einsum("btd,bsd->bts", k.astype(jnp.bfloat16),
                             q.astype(jnp.bfloat16),
                             preferred_element_type=jnp.float32)
            wei = jnp.where(causal[None], wei, -jnp.inf)
            wei = jax.nn.softmax(wei, axis=-1)
            outs.append(jnp.einsum("bts,bsd->btd", wei.astype(jnp.bfloat16),
                                   v.astype(jnp.bfloat16),
                                   preferred_element_type=jnp.float32))
        attn = jnp.concatenate(outs, axis=-1)
        attn = mm(attn, params["wp"][l]) + params["bp"][l]
        z = z1 + attn
        z2 = _layer_norm(z, params["ln2g"][l], params["ln2b"][l])
        ff = mm(jnp.maximum(mm(z2, params["w1"][l]) + params["b1"][l], 0.0),
                params["w2"][l]) + params["b2"][l]
        x = z2 + ff

    zf = _layer_norm(x, params["lnf_g"], params["lnf_b"])
    logits = mm(zf, params["w_head"]) + params["b_head"]
    return logits[:, :, :V]


# ---------------------------------------------------------------------------
# Deterministic parameter init (fused / layer-stacked layout)
# ---------------------------------------------------------------------------
def init_params(key, vocab_size, embed_size, block_size, n_heads, n_blocks):
    E = embed_size
    Vp = ((vocab_size + 127) // 128) * 128          # lane-dense padded vocab
    keys = iter(jax.random.split(key, 4 + 7 * n_blocks))

    def wf(k, shape, scale=0.02):
        return (scale * jax.random.normal(k, shape)).astype(jnp.float32)

    def wb(k, shape, scale=0.02):
        # MXU-side weights stored in bf16; accumulation is f32 in-kernel.
        return wf(k, shape, scale).astype(jnp.bfloat16)

    params = {
        "n_heads": n_heads,
        "vocab_size": vocab_size,
        "tok_emb": wf(next(keys), (vocab_size, E), 1.0),
        "pos_emb": wf(next(keys), (block_size, E), 1.0),
        "lnf_g": jnp.ones((1, E), jnp.float32),
        "lnf_b": jnp.zeros((1, E), jnp.float32),
        "w_head": jnp.zeros((E, Vp), jnp.bfloat16)
                     .at[:, :vocab_size].set(wb(next(keys), (E, vocab_size))),
        "b_head": jnp.zeros((1, Vp), jnp.float32)
                     .at[:, :vocab_size].set(wf(next(keys), (1, vocab_size))),
    }

    wqkv, wp, bp, w1, b1, w2, b2 = ([] for _ in range(7))
    for _ in range(n_blocks):
        wqkv.append(wb(next(keys), (E, 3 * E)))     # [K heads | Q heads | V heads]
        wp.append(wb(next(keys), (E, E)))
        bp.append(wf(next(keys), (1, E)))
        w1.append(wb(next(keys), (E, 4 * E)))
        b1.append(wf(next(keys), (1, 4 * E)))
        w2.append(wb(next(keys), (4 * E, E)))
        b2.append(wf(next(keys), (1, E)))

    params.update(
        wqkv=jnp.stack(wqkv), wp=jnp.stack(wp), bp=jnp.stack(bp),
        w1=jnp.stack(w1), b1=jnp.stack(b1), w2=jnp.stack(w2), b2=jnp.stack(b2),
        ln1g=jnp.ones((n_blocks, 1, E), jnp.float32),
        ln1b=jnp.zeros((n_blocks, 1, E), jnp.float32),
        ln2g=jnp.ones((n_blocks, 1, E), jnp.float32),
        ln2b=jnp.zeros((n_blocks, 1, E), jnp.float32),
    )
    return params


# ---------------------------------------------------------------------------
if __name__ == "__main__":
    vocab_size, embed_size, block_size = 64, 32, 8
    n_heads, n_blocks = 2, 2
    B, T = 2, 8

    key = jax.random.PRNGKey(0)
    pkey, tkey = jax.random.split(key)
    params = init_params(pkey, vocab_size, embed_size, block_size,
                         n_heads, n_blocks)
    tokens = jax.random.randint(tkey, (B, T), 0, vocab_size, dtype=jnp.int32)

    logits = jax.block_until_ready(transformer_forward(tokens, params))
    ref = jax.block_until_ready(reference_forward(tokens, params))

    assert logits.shape == (B, T, vocab_size), logits.shape
    max_err = float(jnp.max(jnp.abs(logits - ref)))
    assert jnp.allclose(logits, ref, atol=2e-3, rtol=2e-3), max_err

    print("KERNEL_OK")
</pallas_src>

<mosaic_0001>
module attributes {stable_mosaic.version = 11 : i64} {
  func.func @transformer_stack_kernel(%arg0: i32, %arg1: memref<16x32xf32, #tpu.memory_space<vmem>>, %arg2: memref<1x32x96xbf16, #tpu.memory_space<vmem>>, %arg3: memref<1x32x32xbf16, #tpu.memory_space<vmem>>, %arg4: memref<1x1x32xf32, #tpu.memory_space<vmem>>, %arg5: memref<1x1x32xf32, #tpu.memory_space<vmem>>, %arg6: memref<1x1x32xf32, #tpu.memory_space<vmem>>, %arg7: memref<1x1x32xf32, #tpu.memory_space<vmem>>, %arg8: memref<1x1x32xf32, #tpu.memory_space<vmem>>, %arg9: memref<1x32x128xbf16, #tpu.memory_space<vmem>>, %arg10: memref<1x1x128xf32, #tpu.memory_space<vmem>>, %arg11: memref<1x128x32xbf16, #tpu.memory_space<vmem>>, %arg12: memref<1x1x32xf32, #tpu.memory_space<vmem>>, %arg13: memref<1x32xf32, #tpu.memory_space<vmem>>, %arg14: memref<1x32xf32, #tpu.memory_space<vmem>>, %arg15: memref<32x128xbf16, #tpu.memory_space<vmem>>, %arg16: memref<1x128xf32, #tpu.memory_space<vmem>>, %arg17: memref<16x128xf32, #tpu.memory_space<vmem>>, %arg18: memref<16x32xf32, #tpu.memory_space<vmem>>) attributes {dimension_semantics = [#tpu.dimension_semantics<arbitrary>], iteration_bounds = array<i64: 2>, scalar_prefetch = 0 : i64, scratch_operands = 1 : i64, tpu.core_type = #tpu.core_type<tc>, window_params = [{pipeline_mode = #tpu.pipeline_mode<synchronous>, transform_indices = @transform_0, window_bounds = array<i64: 16, 32>}, {transform_indices = @transform_1, window_bounds = array<i64: 1, 32, 96>}, {transform_indices = @transform_2, window_bounds = array<i64: 1, 32, 32>}, {transform_indices = @transform_3, window_bounds = array<i64: 1, 1, 32>}, {transform_indices = @transform_4, window_bounds = array<i64: 1, 1, 32>}, {transform_indices = @transform_5, window_bounds = array<i64: 1, 1, 32>}, {transform_indices = @transform_6, window_bounds = array<i64: 1, 1, 32>}, {transform_indices = @transform_7, window_bounds = array<i64: 1, 1, 32>}, {transform_indices = @transform_8, window_bounds = array<i64: 1, 32, 128>}, {transform_indices = @transform_9, window_bounds = array<i64: 1, 1, 128>}, {transform_indices = @transform_10, window_bounds = array<i64: 1, 128, 32>}, {transform_indices = @transform_11, window_bounds = array<i64: 1, 1, 32>}, {pipeline_mode = #tpu.pipeline_mode<synchronous>, transform_indices = @transform_12, window_bounds = array<i64: 1, 32>}, {pipeline_mode = #tpu.pipeline_mode<synchronous>, transform_indices = @transform_13, window_bounds = array<i64: 1, 32>}, {pipeline_mode = #tpu.pipeline_mode<synchronous>, transform_indices = @transform_14, window_bounds = array<i64: 32, 128>}, {pipeline_mode = #tpu.pipeline_mode<synchronous>, transform_indices = @transform_15, window_bounds = array<i64: 1, 128>}, {pipeline_mode = #tpu.pipeline_mode<synchronous>, transform_indices = @transform_16, window_bounds = array<i64: 16, 128>}]} {
    %c0_i32 = arith.constant 0 : i32
    %0 = arith.cmpi eq, %arg0, %c0_i32 : i32
    %1 = arith.extui %0 : i1 to i32
    %c0_i32_0 = arith.constant 0 : i32
    %2 = arith.cmpi ne, %1, %c0_i32_0 : i32
    scf.if %2 {
      %c0_65 = arith.constant 0 : index
      %c0_66 = arith.constant 0 : index
      %150 = vector.load %arg1[%c0_65, %c0_66] : memref<16x32xf32, #tpu.memory_space<vmem>>, vector<16x32xf32>
      %c0_67 = arith.constant 0 : index
      %c0_68 = arith.constant 0 : index
      %151 = vector.load %arg18[%c0_67, %c0_68] : memref<16x32xf32, #tpu.memory_space<vmem>>, vector<16x32xf32>
      tpu.vector_store %arg18[%c0_67, %c0_68], %150 {strides = array<i32>} : memref<16x32xf32, #tpu.memory_space<vmem>>, vector<16x32xf32>,
    } else {
    }
    %c0 = arith.constant 0 : index
    %c0_1 = arith.constant 0 : index
    %3 = vector.load %arg18[%c0, %c0_1] : memref<16x32xf32, #tpu.memory_space<vmem>>, vector<16x32xf32>
    %c0_2 = arith.constant 0 : index
    %c0_3 = arith.constant 0 : index
    %c0_4 = arith.constant 0 : index
    %4 = vector.load %arg5[%c0_2, %c0_3, %c0_4] : memref<1x1x32xf32, #tpu.memory_space<vmem>>, vector<1x1x32xf32>
    %5 = vector.shape_cast %4 : vector<1x1x32xf32> to vector<1x32xf32>
    %c0_5 = arith.constant 0 : index
    %c0_6 = arith.constant 0 : index
    %c0_7 = arith.constant 0 : index
    %6 = vector.load %arg6[%c0_5, %c0_6, %c0_7] : memref<1x1x32xf32, #tpu.memory_space<vmem>>, vector<1x1x32xf32>
    %7 = vector.shape_cast %6 : vector<1x1x32xf32> to vector<1x32xf32>
    %cst = arith.constant dense<0.000000e+00> : vector<16xf32>
    %8 = vector.multi_reduction <add>, %3, %cst [1] : vector<16x32xf32> to vector<16xf32>
    %9 = vector.shape_cast %8 : vector<16xf32> to vector<16x1xf32>
    %cst_8 = arith.constant 3.200000e+01 : f32
    %10 = vector.broadcast %cst_8 : f32 to vector<16x1xf32>
    %11 = arith.divf %9, %10 : vector<16x1xf32>
    %12 = vector.broadcast %11 : vector<16x1xf32> to vector<16x32xf32>
    %13 = arith.subf %3, %12 : vector<16x32xf32>
    %14 = arith.mulf %13, %13 : vector<16x32xf32>
    %cst_9 = arith.constant dense<0.000000e+00> : vector<16xf32>
    %15 = vector.multi_reduction <add>, %14, %cst_9 [1] : vector<16x32xf32> to vector<16xf32>
    %16 = vector.shape_cast %15 : vector<16xf32> to vector<16x1xf32>
    %cst_10 = arith.constant 3.200000e+01 : f32
    %17 = vector.broadcast %cst_10 : f32 to vector<16x1xf32>
    %18 = arith.divf %16, %17 : vector<16x1xf32>
    %19 = vector.broadcast %11 : vector<16x1xf32> to vector<16x32xf32>
    %20 = arith.subf %3, %19 : vector<16x32xf32>
    %cst_11 = arith.constant 9.99999974E-6 : f32
    %21 = vector.broadcast %cst_11 : f32 to vector<16x1xf32>
    %22 = arith.addf %18, %21 : vector<16x1xf32>
    %23 = math.rsqrt %22 : vector<16x1xf32>
    %24 = vector.broadcast %23 : vector<16x1xf32> to vector<16x32xf32>
    %25 = arith.mulf %20, %24 : vector<16x32xf32>
    %26 = vector.broadcast %5 : vector<1x32xf32> to vector<16x32xf32>
    %27 = arith.mulf %25, %26 : vector<16x32xf32>
    %28 = vector.broadcast %7 : vector<1x32xf32> to vector<16x32xf32>
    %29 = arith.addf %27, %28 : vector<16x32xf32>
    %30 = arith.truncf %29 : vector<16x32xf32> to vector<16x32xbf16>
    %c0_12 = arith.constant 0 : index
    %c0_13 = arith.constant 0 : index
    %c0_14 = arith.constant 0 : index
    %31 = vector.load %arg2[%c0_12, %c0_13, %c0_14] : memref<1x32x96xbf16, #tpu.memory_space<vmem>>, vector<1x32x96xbf16>
    %32 = vector.shape_cast %31 : vector<1x32x96xbf16> to vector<32x96xbf16>
    %cst_15 = arith.constant dense<0.000000e+00> : vector<16x96xf32>
    %33 = tpu.matmul %30, %32, %cst_15 {dimension_numbers = #tpu.dot_dimension_numbers<[1], [0], [0], [1], [0, 0, 1, 1], [], []>} : vector<16x32xbf16>, vector<32x96xbf16>, vector<16x96xf32> -> vector<16x96xf32>
    %34 = vector.extract_strided_slice %33 {offsets = [0, 0], sizes = [16, 32], strides = [1, 1]} : vector<16x96xf32> to vector<16x32xf32>
    %35 = arith.truncf %34 : vector<16x32xf32> to vector<16x32xbf16>
    %36 = vector.extract_strided_slice %33 {offsets = [0, 32], sizes = [16, 32], strides = [1, 1]} : vector<16x96xf32> to vector<16x32xf32>
    %cst_16 = arith.constant 2.500000e-01 : f32
    %37 = vector.broadcast %cst_16 : f32 to vector<16x32xf32>
    %38 = arith.mulf %36, %37 : vector<16x32xf32>
    %39 = arith.truncf %38 : vector<16x32xf32> to vector<16x32xbf16>
    %40 = vector.extract_strided_slice %33 {offsets = [0, 64], sizes = [16, 32], strides = [1, 1]} : vector<16x96xf32> to vector<16x32xf32>
    %41 = arith.truncf %40 : vector<16x32xf32> to vector<16x32xbf16>
    %42 = tpu.iota {dimensions = array<i32: 1>} : vector<2x8x8xi32>
    %43 = tpu.iota {dimensions = array<i32: 2>} : vector<2x8x8xi32>
    %44 = arith.cmpi sle, %43, %42 : vector<2x8x8xi32>
    %45 = vector.extract_strided_slice %35 {offsets = [0, 0], sizes = [16, 16], strides = [1, 1]} : vector<16x32xbf16> to vector<16x16xbf16>
    %46 = vector.shape_cast %45 : vector<16x16xbf16> to vector<2x8x16xbf16>
    %47 = vector.extract_strided_slice %39 {offsets = [0, 0], sizes = [16, 16], strides = [1, 1]} : vector<16x32xbf16> to vector<16x16xbf16>
    %48 = vector.shape_cast %47 : vector<16x16xbf16> to vector<2x8x16xbf16>
    %49 = vector.extract_strided_slice %41 {offsets = [0, 0], sizes = [16, 16], strides = [1, 1]} : vector<16x32xbf16> to vector<16x16xbf16>
    %50 = vector.shape_cast %49 : vector<16x16xbf16> to vector<2x8x16xbf16>
    "tpu.trace_start"() <{level = 10 : i32, message = "btd,bsd->bts"}> : () -> ()
    %cst_17 = arith.constant dense<0.000000e+00> : vector<2x8x8xf32>
    %51 = tpu.matmul %46, %48, %cst_17 {dimension_numbers = #tpu.dot_dimension_numbers<[2], [2], [1], [1], [0, 0, 0, 1, 1, 1], [0], [0]>} : vector<2x8x16xbf16>, vector<2x8x16xbf16>, vector<2x8x8xf32> -> vector<2x8x8xf32>
    %cst_18 = arith.constant 0xFF800000 : f32
    "tpu.trace_stop"() : () -> ()
    %52 = vector.broadcast %cst_18 : f32 to vector<2x8x8xf32>
    %53 = arith.select %44, %51, %52 : vector<2x8x8xi1>, vector<2x8x8xf32>
    %cst_19 = arith.constant dense<0xFF800000> : vector<2x8xf32>
    %54 = vector.multi_reduction <maximumf>, %53, %cst_19 [2] : vector<2x8x8xf32> to vector<2x8xf32>
    %cst_20 = arith.constant 0xFF800000 : f32
    %55 = vector.broadcast %cst_20 : f32 to vector<2x8xf32>
    %56 = arith.maximumf %55, %54 : vector<2x8xf32>
    %57 = vector.shape_cast %56 : vector<2x8xf32> to vector<2x8x1xf32>
    %58 = vector.broadcast %57 : vector<2x8x1xf32> to vector<2x8x8xf32>
    %59 = arith.subf %53, %58 : vector<2x8x8xf32>
    %60 = math.exp %59 : vector<2x8x8xf32>
    %cst_21 = arith.constant dense<0.000000e+00> : vector<2x8xf32>
    %61 = vector.multi_reduction <add>, %60, %cst_21 [2] : vector<2x8x8xf32> to vector<2x8xf32>
    %62 = vector.shape_cast %61 : vector<2x8xf32> to vector<2x8x1xf32>
    %63 = vector.broadcast %62 : vector<2x8x1xf32> to vector<2x8x8xf32>
    %64 = arith.divf %60, %63 : vector<2x8x8xf32>
    %65 = arith.truncf %64 : vector<2x8x8xf32> to vector<2x8x8xbf16>
    "tpu.trace_start"() <{level = 10 : i32, message = "bts,bsd->btd"}> : () -> ()
    %cst_22 = arith.constant dense<0.000000e+00> : vector<2x8x16xf32>
    %66 = tpu.matmul %65, %50, %cst_22 {dimension_numbers = #tpu.dot_dimension_numbers<[2], [1], [1], [2], [0, 0, 0, 1, 1, 2], [0], [0]>} : vector<2x8x8xbf16>, vector<2x8x16xbf16>, vector<2x8x16xf32> -> vector<2x8x16xf32>
    "tpu.trace_stop"() : () -> ()
    %67 = vector.shape_cast %66 : vector<2x8x16xf32> to vector<16x16xf32>
    %68 = vector.extract_strided_slice %35 {offsets = [0, 16], sizes = [16, 16], strides = [1, 1]} : vector<16x32xbf16> to vector<16x16xbf16>
    %69 = vector.shape_cast %68 : vector<16x16xbf16> to vector<2x8x16xbf16>
    %70 = vector.extract_strided_slice %39 {offsets = [0, 16], sizes = [16, 16], strides = [1, 1]} : vector<16x32xbf16> to vector<16x16xbf16>
    %71 = vector.shape_cast %70 : vector<16x16xbf16> to vector<2x8x16xbf16>
    %72 = vector.extract_strided_slice %41 {offsets = [0, 16], sizes = [16, 16], strides = [1, 1]} : vector<16x32xbf16> to vector<16x16xbf16>
    %73 = vector.shape_cast %72 : vector<16x16xbf16> to vector<2x8x16xbf16>
    "tpu.trace_start"() <{level = 10 : i32, message = "btd,bsd->bts"}> : () -> ()
    %cst_23 = arith.constant dense<0.000000e+00> : vector<2x8x8xf32>
    %74 = tpu.matmul %69, %71, %cst_23 {dimension_numbers = #tpu.dot_dimension_numbers<[2], [2], [1], [1], [0, 0, 0, 1, 1, 1], [0], [0]>} : vector<2x8x16xbf16>, vector<2x8x16xbf16>, vector<2x8x8xf32> -> vector<2x8x8xf32>
    %cst_24 = arith.constant 0xFF800000 : f32
    "tpu.trace_stop"() : () -> ()
    %75 = vector.broadcast %cst_24 : f32 to vector<2x8x8xf32>
    %76 = arith.select %44, %74, %75 : vector<2x8x8xi1>, vector<2x8x8xf32>
    %cst_25 = arith.constant dense<0xFF800000> : vector<2x8xf32>
    %77 = vector.multi_reduction <maximumf>, %76, %cst_25 [2] : vector<2x8x8xf32> to vector<2x8xf32>
    %cst_26 = arith.constant 0xFF800000 : f32
    %78 = vector.broadcast %cst_26 : f32 to vector<2x8xf32>
    %79 = arith.maximumf %78, %77 : vector<2x8xf32>
    %80 = vector.shape_cast %79 : vector<2x8xf32> to vector<2x8x1xf32>
    %81 = vector.broadcast %80 : vector<2x8x1xf32> to vector<2x8x8xf32>
    %82 = arith.subf %76, %81 : vector<2x8x8xf32>
    %83 = math.exp %82 : vector<2x8x8xf32>
    %cst_27 = arith.constant dense<0.000000e+00> : vector<2x8xf32>
    %84 = vector.multi_reduction <add>, %83, %cst_27 [2] : vector<2x8x8xf32> to vector<2x8xf32>
    %85 = vector.shape_cast %84 : vector<2x8xf32> to vector<2x8x1xf32>
    %86 = vector.broadcast %85 : vector<2x8x1xf32> to vector<2x8x8xf32>
    %87 = arith.divf %83, %86 : vector<2x8x8xf32>
    %88 = arith.truncf %87 : vector<2x8x8xf32> to vector<2x8x8xbf16>
    "tpu.trace_start"() <{level = 10 : i32, message = "bts,bsd->btd"}> : () -> ()
    %cst_28 = arith.constant dense<0.000000e+00> : vector<2x8x16xf32>
    %89 = tpu.matmul %88, %73, %cst_28 {dimension_numbers = #tpu.dot_dimension_numbers<[2], [1], [1], [2], [0, 0, 0, 1, 1, 2], [0], [0]>} : vector<2x8x8xbf16>, vector<2x8x16xbf16>, vector<2x8x16xf32> -> vector<2x8x16xf32>
    "tpu.trace_stop"() : () -> ()
    %90 = vector.shape_cast %89 : vector<2x8x16xf32> to vector<16x16xf32>
    %91 = tpu.concatenate %67, %90 in 1 : vector<16x16xf32>, vector<16x16xf32> -> vector<16x32xf32>
    %92 = arith.truncf %91 : vector<16x32xf32> to vector<16x32xbf16>
    %c0_29 = arith.constant 0 : index
    %c0_30 = arith.constant 0 : index
    %c0_31 = arith.constant 0 : index
    %93 = vector.load %arg3[%c0_29, %c0_30, %c0_31] : memref<1x32x32xbf16, #tpu.memory_space<vmem>>, vector<1x32x32xbf16>
    %94 = vector.shape_cast %93 : vector<1x32x32xbf16> to vector<32x32xbf16>
    %cst_32 = arith.constant dense<0.000000e+00> : vector<16x32xf32>
    %95 = tpu.matmul %92, %94, %cst_32 {dimension_numbers = #tpu.dot_dimension_numbers<[1], [0], [0], [1], [0, 0, 1, 1], [], []>} : vector<16x32xbf16>, vector<32x32xbf16>, vector<16x32xf32> -> vector<16x32xf32>
    %c0_33 = arith.constant 0 : index
    %c0_34 = arith.constant 0 : index
    %c0_35 = arith.constant 0 : index
    %96 = vector.load %arg4[%c0_33, %c0_34, %c0_35] : memref<1x1x32xf32, #tpu.memory_space<vmem>>, vector<1x1x32xf32>
    %97 = vector.shape_cast %96 : vector<1x1x32xf32> to vector<1x32xf32>
    %98 = vector.broadcast %97 : vector<1x32xf32> to vector<16x32xf32>
    %99 = arith.addf %95, %98 : vector<16x32xf32>
    %100 = arith.addf %29, %99 : vector<16x32xf32>
    %c0_36 = arith.constant 0 : index
    %c0_37 = arith.constant 0 : index
    %c0_38 = arith.constant 0 : index
    %101 = vector.load %arg7[%c0_36, %c0_37, %c0_38] : memref<1x1x32xf32, #tpu.memory_space<vmem>>, vector<1x1x32xf32>
    %102 = vector.shape_cast %101 : vector<1x1x32xf32> to vector<1x32xf32>
    %c0_39 = arith.constant 0 : index
    %c0_40 = arith.constant 0 : index
    %c0_41 = arith.constant 0 : index
    %103 = vector.load %arg8[%c0_39, %c0_40, %c0_41] : memref<1x1x32xf32, #tpu.memory_space<vmem>>, vector<1x1x32xf32>
    %104 = vector.shape_cast %103 : vector<1x1x32xf32> to vector<1x32xf32>
    %cst_42 = arith.constant dense<0.000000e+00> : vector<16xf32>
    %105 = vector.multi_reduction <add>, %100, %cst_42 [1] : vector<16x32xf32> to vector<16xf32>
    %106 = vector.shape_cast %105 : vector<16xf32> to vector<16x1xf32>
    %cst_43 = arith.constant 3.200000e+01 : f32
    %107 = vector.broadcast %cst_43 : f32 to vector<16x1xf32>
    %108 = arith.divf %106, %107 : vector<16x1xf32>
    %109 = vector.broadcast %108 : vector<16x1xf32> to vector<16x32xf32>
    %110 = arith.subf %100, %109 : vector<16x32xf32>
    %111 = arith.mulf %110, %110 : vector<16x32xf32>
    %cst_44 = arith.constant dense<0.000000e+00> : vector<16xf32>
    %112 = vector.multi_reduction <add>, %111, %cst_44 [1] : vector<16x32xf32> to vector<16xf32>
    %113 = vector.shape_cast %112 : vector<16xf32> to vector<16x1xf32>
    %cst_45 = arith.constant 3.200000e+01 : f32
    %114 = vector.broadcast %cst_45 : f32 to vector<16x1xf32>
    %115 = arith.divf %113, %114 : vector<16x1xf32>
    %116 = vector.broadcast %108 : vector<16x1xf32> to vector<16x32xf32>
    %117 = arith.subf %100, %116 : vector<16x32xf32>
    %cst_46 = arith.constant 9.99999974E-6 : f32
    %118 = vector.broadcast %cst_46 : f32 to vector<16x1xf32>
    %119 = arith.addf %115, %118 : vector<16x1xf32>
    %120 = math.rsqrt %119 : vector<16x1xf32>
    %121 = vector.broadcast %120 : vector<16x1xf32> to vector<16x32xf32>
    %122 = arith.mulf %117, %121 : vector<16x32xf32>
    %123 = vector.broadcast %102 : vector<1x32xf32> to vector<16x32xf32>
    %124 = arith.mulf %122, %123 : vector<16x32xf32>
    %125 = vector.broadcast %104 : vector<1x32xf32> to vector<16x32xf32>
    %126 = arith.addf %124, %125 : vector<16x32xf32>
    %127 = arith.truncf %126 : vector<16x32xf32> to vector<16x32xbf16>
    %c0_47 = arith.constant 0 : index
    %c0_48 = arith.constant 0 : index
    %c0_49 = arith.constant 0 : index
    %128 = vector.load %arg9[%c0_47, %c0_48, %c0_49] : memref<1x32x128xbf16, #tpu.memory_space<vmem>>, vector<1x32x128xbf16>
    %129 = vector.shape_cast %128 : vector<1x32x128xbf16> to vector<32x128xbf16>
    %cst_50 = arith.constant dense<0.000000e+00> : vector<16x128xf32>
    %130 = tpu.matmul %127, %129, %cst_50 {dimension_numbers = #tpu.dot_dimension_numbers<[1], [0], [0], [1], [0, 0, 1, 1], [], []>} : vector<16x32xbf16>, vector<32x128xbf16>, vector<16x128xf32> -> vector<16x128xf32>
    %c0_51 = arith.constant 0 : index
    %c0_52 = arith.constant 0 : index
    %c0_53 = arith.constant 0 : index
    %131 = vector.load %arg10[%c0_51, %c0_52, %c0_53] : memref<1x1x128xf32, #tpu.memory_space<vmem>>, vector<1x1x128xf32>
    %132 = vector.shape_cast %131 : vector<1x1x128xf32> to vector<1x128xf32>
    %133 = vector.broadcast %132 : vector<1x128xf32> to vector<16x128xf32>
    %134 = arith.addf %130, %133 : vector<16x128xf32>
    %cst_54 = arith.constant 0.000000e+00 : f32
    %135 = vector.broadcast %cst_54 : f32 to vector<16x128xf32>
    %136 = arith.maximumf %134, %135 : vector<16x128xf32>
    %137 = arith.truncf %136 : vector<16x128xf32> to vector<16x128xbf16>
    %c0_55 = arith.constant 0 : index
    %c0_56 = arith.constant 0 : index
    %c0_57 = arith.constant 0 : index
    %138 = vector.load %arg11[%c0_55, %c0_56, %c0_57] : memref<1x128x32xbf16, #tpu.memory_space<vmem>>, vector<1x128x32xbf16>
    %139 = vector.shape_cast %138 : vector<1x128x32xbf16> to vector<128x32xbf16>
    %cst_58 = arith.constant dense<0.000000e+00> : vector<16x32xf32>
    %140 = tpu.matmul %137, %139, %cst_58 {dimension_numbers = #tpu.dot_dimension_numbers<[1], [0], [0], [1], [0, 0, 1, 1], [], []>} : vector<16x128xbf16>, vector<128x32xbf16>, vector<16x32xf32> -> vector<16x32xf32>
    %c0_59 = arith.constant 0 : index
    %c0_60 = arith.constant 0 : index
    %c0_61 = arith.constant 0 : index
    %141 = vector.load %arg12[%c0_59, %c0_60, %c0_61] : memref<1x1x32xf32, #tpu.memory_space<vmem>>, vector<1x1x32xf32>
    %142 = vector.shape_cast %141 : vector<1x1x32xf32> to vector<1x32xf32>
    %143 = vector.broadcast %142 : vector<1x32xf32> to vector<16x32xf32>
    %144 = arith.addf %140, %143 : vector<16x32xf32>
    %145 = arith.addf %126, %144 : vector<16x32xf32>
    %c0_62 = arith.constant 0 : index
    %c0_63 = arith.constant 0 : index
    %146 = vector.load %arg18[%c0_62, %c0_63] : memref<16x32xf32, #tpu.memory_space<vmem>>, vector<16x32xf32>
    tpu.vector_store %arg18[%c0_62, %c0_63], %145 {strides = array<i32>} : memref<16x32xf32, #tpu.memory_space<vmem>>, vector<16x32xf32>,
    %c1_i32 = arith.constant 1 : i32
    %147 = arith.cmpi eq, %arg0, %c1_i32 : i32
    %148 = arith.extui %147 : i1 to i32
    %c0_i32_64 = arith.constant 0 : i32
    %149 = arith.cmpi ne, %148, %c0_i32_64 : i32
    scf.if %149 {
      %c0_65 = arith.constant 0 : index
      %c0_66 = arith.constant 0 : index
      %150 = vector.load %arg13[%c0_65, %c0_66] : memref<1x32xf32, #tpu.memory_space<vmem>>, vector<1x32xf32>
      %c0_67 = arith.constant 0 : index
      %c0_68 = arith.constant 0 : index
      %151 = vector.load %arg14[%c0_67, %c0_68] : memref<1x32xf32, #tpu.memory_space<vmem>>, vector<1x32xf32>
      %cst_69 = arith.constant dense<0.000000e+00> : vector<16xf32>
      %152 = vector.multi_reduction <add>, %145, %cst_69 [1] : vector<16x32xf32> to vector<16xf32>
      %153 = vector.shape_cast %152 : vector<16xf32> to vector<16x1xf32>
      %cst_70 = arith.constant 3.200000e+01 : f32
      %154 = vector.broadcast %cst_70 : f32 to vector<16x1xf32>
      %155 = arith.divf %153, %154 : vector<16x1xf32>
      %156 = vector.broadcast %155 : vector<16x1xf32> to vector<16x32xf32>
      %157 = arith.subf %145, %156 : vector<16x32xf32>
      %158 = arith.mulf %157, %157 : vector<16x32xf32>
      %cst_71 = arith.constant dense<0.000000e+00> : vector<16xf32>
      %159 = vector.multi_reduction <add>, %158, %cst_71 [1] : vector<16x32xf32> to vector<16xf32>
      %160 = vector.shape_cast %159 : vector<16xf32> to vector<16x1xf32>
      %cst_72 = arith.constant 3.200000e+01 : f32
      %161 = vector.broadcast %cst_72 : f32 to vector<16x1xf32>
      %162 = arith.divf %160, %161 : vector<16x1xf32>
      %163 = vector.broadcast %155 : vector<16x1xf32> to vector<16x32xf32>
      %164 = arith.subf %145, %163 : vector<16x32xf32>
      %cst_73 = arith.constant 9.99999974E-6 : f32
      %165 = vector.broadcast %cst_73 : f32 to vector<16x1xf32>
      %166 = arith.addf %162, %165 : vector<16x1xf32>
      %167 = math.rsqrt %166 : vector<16x1xf32>
      %168 = vector.broadcast %167 : vector<16x1xf32> to vector<16x32xf32>
      %169 = arith.mulf %164, %168 : vector<16x32xf32>
      %170 = vector.broadcast %150 : vector<1x32xf32> to vector<16x32xf32>
      %171 = arith.mulf %169, %170 : vector<16x32xf32>
      %172 = vector.broadcast %151 : vector<1x32xf32> to vector<16x32xf32>
      %173 = arith.addf %171, %172 : vector<16x32xf32>
      %174 = arith.truncf %173 : vector<16x32xf32> to vector<16x32xbf16>
      %c0_74 = arith.constant 0 : index
      %c0_75 = arith.constant 0 : index
      %175 = vector.load %arg15[%c0_74, %c0_75] : memref<32x128xbf16, #tpu.memory_space<vmem>>, vector<32x128xbf16>
      %cst_76 = arith.constant dense<0.000000e+00> : vector<16x128xf32>
      %176 = tpu.matmul %174, %175, %cst_76 {dimension_numbers = #tpu.dot_dimension_numbers<[1], [0], [0], [1], [0, 0, 1, 1], [], []>} : vector<16x32xbf16>, vector<32x128xbf16>, vector<16x128xf32> -> vector<16x128xf32>
      %c0_77 = arith.constant 0 : index
      %c0_78 = arith.constant 0 : index
      %177 = vector.load %arg16[%c0_77, %c0_78] : memref<1x128xf32, #tpu.memory_space<vmem>>, vector<1x128xf32>
      %178 = vector.broadcast %177 : vector<1x128xf32> to vector<16x128xf32>
      %179 = arith.addf %176, %178 : vector<16x128xf32>
      %c0_79 = arith.constant 0 : index
      %c0_80 = arith.constant 0 : index
      %180 = vector.load %arg17[%c0_79, %c0_80] : memref<16x128xf32, #tpu.memory_space<vmem>>, vector<16x128xf32>
      tpu.vector_store %arg17[%c0_79, %c0_80], %179 {strides = array<i32>} : memref<16x128xf32, #tpu.memory_space<vmem>>, vector<16x128xf32>,
    } else {
    }
    return
  }
  func.func @transform_0(%arg0: i32) -> (i32, i32) {
    %c0_i32 = arith.constant 0 : i32
    %c0_i32_0 = arith.constant 0 : i32
    %c0_i32_1 = arith.constant 0 : i32
    return %c0_i32, %c0_i32_0 : i32, i32
  }
  func.func @transform_1(%arg0: i32) -> (i32, i32, i32) {
    %c0_i32 = arith.constant 0 : i32
    %c0_i32_0 = arith.constant 0 : i32
    %c0_i32_1 = arith.constant 0 : i32
    return %arg0, %c0_i32, %c0_i32_0 : i32, i32, i32
  }
  func.func @transform_2(%arg0: i32) -> (i32, i32, i32) {
    %c0_i32 = arith.constant 0 : i32
    %c0_i32_0 = arith.constant 0 : i32
    %c0_i32_1 = arith.constant 0 : i32
    return %arg0, %c0_i32, %c0_i32_0 : i32, i32, i32
  }
  func.func @transform_3(%arg0: i32) -> (i32, i32, i32) {
    %c0_i32 = arith.constant 0 : i32
    %c0_i32_0 = arith.constant 0 : i32
    %c0_i32_1 = arith.constant 0 : i32
    return %arg0, %c0_i32, %c0_i32_0 : i32, i32, i32
  }
  func.func @transform_4(%arg0: i32) -> (i32, i32, i32) {
    %c0_i32 = arith.constant 0 : i32
    %c0_i32_0 = arith.constant 0 : i32
    %c0_i32_1 = arith.constant 0 : i32
    return %arg0, %c0_i32, %c0_i32_0 : i32, i32, i32
  }
  func.func @transform_5(%arg0: i32) -> (i32, i32, i32) {
    %c0_i32 = arith.constant 0 : i32
    %c0_i32_0 = arith.constant 0 : i32
    %c0_i32_1 = arith.constant 0 : i32
    return %arg0, %c0_i32, %c0_i32_0 : i32, i32, i32
  }
  func.func @transform_6(%arg0: i32) -> (i32, i32, i32) {
    %c0_i32 = arith.constant 0 : i32
    %c0_i32_0 = arith.constant 0 : i32
    %c0_i32_1 = arith.constant 0 : i32
    return %arg0, %c0_i32, %c0_i32_0 : i32, i32, i32
  }
  func.func @transform_7(%arg0: i32) -> (i32, i32, i32) {
    %c0_i32 = arith.constant 0 : i32
    %c0_i32_0 = arith.constant 0 : i32
    %c0_i32_1 = arith.constant 0 : i32
    return %arg0, %c0_i32, %c0_i32_0 : i32, i32, i32
  }
  func.func @transform_8(%arg0: i32) -> (i32, i32, i32) {
    %c0_i32 = arith.constant 0 : i32
    %c0_i32_0 = arith.constant 0 : i32
    %c0_i32_1 = arith.constant 0 : i32
    return %arg0, %c0_i32, %c0_i32_0 : i32, i32, i32
  }
  func.func @transform_9(%arg0: i32) -> (i32, i32, i32) {
    %c0_i32 = arith.constant 0 : i32
    %c0_i32_0 = arith.constant 0 : i32
    %c0_i32_1 = arith.constant 0 : i32
    return %arg0, %c0_i32, %c0_i32_0 : i32, i32, i32
  }
  func.func @transform_10(%arg0: i32) -> (i32, i32, i32) {
    %c0_i32 = arith.constant 0 : i32
    %c0_i32_0 = arith.constant 0 : i32
    %c0_i32_1 = arith.constant 0 : i32
    return %arg0, %c0_i32, %c0_i32_0 : i32, i32, i32
  }
  func.func @transform_11(%arg0: i32) -> (i32, i32, i32) {
    %c0_i32 = arith.constant 0 : i32
    %c0_i32_0 = arith.constant 0 : i32
    %c0_i32_1 = arith.constant 0 : i32
    return %arg0, %c0_i32, %c0_i32_0 : i32, i32, i32
  }
  func.func @transform_12(%arg0: i32) -> (i32, i32) {
    %c0_i32 = arith.constant 0 : i32
    %c0_i32_0 = arith.constant 0 : i32
    %c0_i32_1 = arith.constant 0 : i32
    return %c0_i32, %c0_i32_0 : i32, i32
  }
  func.func @transform_13(%arg0: i32) -> (i32, i32) {
    %c0_i32 = arith.constant 0 : i32
    %c0_i32_0 = arith.constant 0 : i32
    %c0_i32_1 = arith.constant 0 : i32
    return %c0_i32, %c0_i32_0 : i32, i32
  }
  func.func @transform_14(%arg0: i32) -> (i32, i32) {
    %c0_i32 = arith.constant 0 : i32
    %c0_i32_0 = arith.constant 0 : i32
    %c0_i32_1 = arith.constant 0 : i32
    return %c0_i32, %c0_i32_0 : i32, i32
  }
  func.func @transform_15(%arg0: i32) -> (i32, i32) {
    %c0_i32 = arith.constant 0 : i32
    %c0_i32_0 = arith.constant 0 : i32
    %c0_i32_1 = arith.constant 0 : i32
    return %c0_i32, %c0_i32_0 : i32, i32
  }
  func.func @transform_16(%arg0: i32) -> (i32, i32) {
    %c0_i32 = arith.constant 0 : i32
    %c0_i32_0 = arith.constant 0 : i32
    %c0_i32_1 = arith.constant 0 : i32
    return %c0_i32, %c0_i32_0 : i32, i32
  }
}

</mosaic_0001>

<bundles_post_ra>
// kernel: tpu_custom_call.1
= control target key start
LH: loop header
LB: loop body
LE: loop exit
PB: predicated region body
PF: predicated region fallthrough
CT: control target
= control target key end

     0   :  { %s2536_s0 = inlined_call_operand.vmem [shape: f32[16,32], index: 0, kind: input, shape index: {}]   ;;  %s2537_s1 = inlined_call_operand.vmem [shape: bf16[2,32,96], index: 1, kind: input, shape index: {}]   ;;  %s2538_s2 = inlined_call_operand.vmem [shape: bf16[2,32,32], index: 2, kind: input, shape index: {}]   ;;  %s2539_s3 = inlined_call_operand.vmem [shape: f32[2,1,32], index: 3, kind: input, shape index: {}]   ;;  %s2540_s4 = inlined_call_operand.vmem [shape: f32[2,1,32], index: 4, kind: input, shape index: {}]   ;;  %s2541_s5 = inlined_call_operand.vmem [shape: f32[2,1,32], index: 5, kind: input, shape index: {}]   ;;  %s2542_s6 = inlined_call_operand.vmem [shape: f32[2,1,32], index: 6, kind: input, shape index: {}]   ;;  %s2543_s7 = inlined_call_operand.vmem [shape: f32[2,1,32], index: 7, kind: input, shape index: {}]   ;;  %s2544_s8 = inlined_call_operand.vmem [shape: bf16[2,32,128], index: 8, kind: input, shape index: {}]   ;;  %s2545_s9 = inlined_call_operand.vmem [shape: f32[2,1,128], index: 9, kind: input, shape index: {}]   ;;  %s2546_s10 = inlined_call_operand.vmem [shape: bf16[2,128,32], index: 10, kind: input, shape index: {}]   ;;  %s2547_s11 = inlined_call_operand.vmem [shape: f32[2,1,32], index: 11, kind: input, shape index: {}]   ;;  %s2548_s12 = inlined_call_operand.vmem [shape: f32[1,32], index: 12, kind: input, shape index: {}]   ;;  %s2549_s13 = inlined_call_operand.vmem [shape: f32[1,32], index: 13, kind: input, shape index: {}]   ;;  %s2550_s14 = inlined_call_operand.vmem [shape: bf16[32,128], index: 14, kind: input, shape index: {}]   ;;  %s2551_s15 = inlined_call_operand.vmem [shape: f32[1,128], index: 15, kind: input, shape index: {}]   ;;  %s2552_s16 = inlined_call_operand.hbm [shape: f32[16,128], index: 16, kind: output, shape index: {}]  }
   0x1   :  { %2556 = sst [smem:[#allocation7_spill]] %s2536_s0 }
   0x2   :  { %2557 = sst [smem:[#allocation8_spill]] %s2537_s1 }
   0x3   :  { %2558 = sst [smem:[#allocation9_spill]] %s2538_s2 }
   0x4   :  { %2559 = sst [smem:[#allocation10_spill]] %s2548_s12 }
   0x5   :  { %2560 = sst [smem:[#allocation11_spill]] %s2549_s13 }
   0x6   :  { %2561 = sst [smem:[#allocation12_spill]] %s2551_s15 }
   0x7   :  { %2562 = sst [smem:[#allocation13_spill]] %s2552_s16 }
   0x8   :  { %21 = vsyncpa [#allocation4], 0  ;;  %s2240_s21 = smov 0  }
   0x9 LB: > { %2563 = sst [smem:[#allocation6_spill]] %s2140_s21  ;;  %s2246_s22 = sadd.s32 4294967295, %s2140_s21   ;;  %s2140_s21 = sphi %s2240_s21, %s27_s21  }
   0xa   : > { %p1826_p0 = scmp.ge.s32.totalorder %s2140_s21, 1  ;;  %p544_p1 = scmp.lt.s32.totalorder %s2140_s21, 3 }
   0xc   : > { %p545_p2 = pnand %p1826_p0, %p544_p1 }
   0xd   : > { %p625_p3 = scmp.lt.s32.totalorder (!%p545_p2), %s2246_s22, 1  ;;  %s2564_s1 = sld [smem:[#allocation8_spill]] (!%p545_p2) }
   0xe   : > { %548 = sbr.rel (%p545_p2) target bundleno = 3642 (0xe3a), region = 84  ;;  %s2565_s2 = sld [smem:[#allocation9_spill]] (!%p545_p2) }
   0xf   : > { %p1835_p4 = scmp.ne.s32.totalorder (!%p545_p2), %s2246_s22, 0 }
  0x15   : > { %s2252_s23 = scalar_select %p625_p3, %s2246_s22, 1 }
  0x16   : > { %670 = sbr.rel (%p1835_p4) target bundleno = 30 (0x1e), region = 88  ;;  %s2566_s28 = sld [smem:[#allocation7_spill]] (!%p1835_p4)  ;;  %vm673_vm0 = vcmask (!%p1835_p4), 261120  }
  0x17   : > { %s1883_s24 = sshll.u32 %s2252_s23, 4  ;;  %s657_s20 = scalar_lea.vmem %s2545_s9, %s2252_s23 }
  0x18   : > { %s2262_s30 = scalar_lea.vmem %s2564_s1, %s1883_s24  ;;  %s2267_s18 = scalar_lea.vmem %s2565_s2, %s1883_s24 }
  0x19   : > { %s649_s1 = scalar_lea.vmem %s2543_s7, %s2252_s23  ;;  %s2288_s17 = scalar_lea.vmem %s2544_s8, %s1883_s24 }
  0x1a   : > { %s1886_s21 = sshll.u32 %s2252_s23, 6  ;;  %s665_s13 = scalar_lea.vmem %s2547_s11, %s2252_s23 }
  0x1b   : > { %s2302_s27 = scalar_lea.vmem %s2546_s10, %s1886_s21 }
  0x1c   : > { %v671_v0 = vld [vmem:[%s2566_s28] sm:$0xff] (!%p1835_p4)  ;;  %v672_v1 = vld [vmem:[%s2566_s28 + $0x8] sm:$0xff] (!%p1835_p4) }
  0x1d   : > { %674 = vst.msk [vmem:[#allocation2] sm:$0xff] %vm673_vm0, %v671_v0  ;;  %675 = vst.msk [vmem:[#allocation2 + $0x8] sm:$0xff] %vm673_vm0, %v672_v1 }
  0x1e PF: > { %vm680_vm1 = vcmask 261120   ;;  %v2060_v16 = vld [vmem:[%s2262_s30] sm:$0xff]   ;;  %v2142_v17 = vmov 0.0   ;;  %v2061_v18 = vld [vmem:[%s2262_s30 + $0x8] sm:$0xff]   ;;  %vm2143_vm2 = vmmov 0   ;;  %s2567_s0 = scalar_lea.vmem %s2540_s4, %s2252_s23  ;;  %s2568_s16 = scalar_lea.vmem %s2541_s5, %s2252_s23  ;;  %vm805_vm3 = vcmask 130048  }
  0x1f   : > { %1928 = vmatprep.subr.bf16.mxu0 %v2142_v17  ;;  %1948 = vmatprep.subr.bf16.mxu1 %v2142_v17  ;;  %v1836_v27 = vld [vmem:[%s2567_s0] ss:$0 sm:$0xff]  ;;  %s2144_s25 = smov 96   ;;  %v789_v50 = vlaneseq  ;;  %vm903_vm5 = vcmask 64512   ;;  %s2145_s26 = smov 64   ;;  %vm933_vm6 = vcmask 1043456  }
  0x20   : > { %1929 = vmatpush3.bf16.msra.mxu0 %v2060_v16  ;;  %1932 = vmatprep.mubr.msk.bf16.mxu0 %vm2143_vm2, %v2142_v17  ;;  %v1837_v31 = vld [vmem:[%s2568_s16] ss:$0 sm:$0xff]  ;;  %s2146_s12 = smov 80   ;;  %s2147_s24 = smov 112  }
  0x21   : > { %1930 = vmatprep.subr.bf16.mxu0 %v2142_v17  ;;  %1950 = vmatprep.mubr.msk.bf16.mxu1 %vm2143_vm2, %v2142_v17  ;;  %v2360_v51 = vshrl.u32 %v789_v50, 7  ;;  %v2362_v52 = vand.u32 127, %v789_v50  ;;  %s2148_s2 = smov 48   ;;  %s2149_s29 = smov 16  }
  0x22   : > { %s2569_s30 = scalar_lea.vmem %s2539_s3, %s2252_s23  ;;  %s2570_s19 = scalar_lea.vmem %s2542_s6, %s2252_s23 }
  0x23   : > { %vm793_vm4 = vcmp.le.s32.totalorder %v2362_v52, %v2360_v51  ;;  %p1872_p5 = scmp.ne.s32.totalorder %s2246_s22, 1 }
  0x24   : > { %v676_v2 = vld [vmem:[#allocation2] sm:$0xff]  ;;  %v677_v3 = vld [vmem:[#allocation2 + $0x8] sm:$0xff]  ;;  %1931 = vmatpush3.bf16.msra.mxu0 %v2061_v18  ;;  %vm2151_vm7 = vmmov (!%p1872_p5), 0  }
  0x25   : > { %v681_v4 = vsel %vm680_vm1, %v676_v2, 0.0  ;;  %v684_v5 = vsel %vm680_vm1, %v677_v3, 0.0  ;;  %1936 = vmatprep.subr.bf16.mxu0 %v2142_v17 }
  0x26   : > { %682 = vadd.xlane.f32.xlu0 %v681_v4 }
  0x2a   : > { %685 = vadd.xlane.f32.xlu0 %v684_v5 }
  0xb3   : > { %v683_v6 = vpop.xlane.xlu0 %682 }
  0xb4   : > { %v688_v7 = vmul.f32 0.03125, %v683_v6 }
  0xb6   : > { %v690_v8 = vsub.f32 %v676_v2, %v688_v7 }
  0xb7   : > { %v686_v9 = vpop.xlane.xlu0 %685 }
  0xb8   : > { %v689_v10 = vmul.f32 0.03125, %v686_v9  ;;  %v692_v11 = vmul.f32 %v690_v8, %v690_v8 }
  0xba   : > { %v691_v12 = vsub.f32 %v677_v3, %v689_v10  ;;  %v694_v13 = vsel %vm680_vm1, %v692_v11, 0.0 }
  0xbb   : > { %695 = vadd.xlane.f32.xlu1 %v694_v13 }
  0xbc   : > { %v693_v14 = vmul.f32 %v691_v12, %v691_v12 }
  0xbe   : > { %v697_v15 = vsel %vm680_vm1, %v693_v14, 0.0 }
  0xbf   : > { %698 = vadd.xlane.f32.xlu1 %v697_v15 }
 0x148   : > { %v696_v19 = vpop.xlane.xlu1 %695 }
 0x149   : > { %v700_v20 = vmul.f32 0.03125, %v696_v19 }
 0x14b   : > { %v702_v21 = vadd.f32 1e-05, %v700_v20 }
 0x14c   : > { %v699_v22 = vpop.xlane.xlu1 %698 }
 0x14d   : > { %2074 = vrsqrt.f32 %v702_v21  ;;  %v701_v23 = vmul.f32 0.03125, %v699_v22 }
 0x14f   : > { %v703_v24 = vadd.f32 1e-05, %v701_v23 }
 0x151   : > { %2076 = vrsqrt.f32 %v703_v24 }
 0x157   : > { %v2075_v25 = vpop.eup %2074 }
 0x158   : > { %v706_v26 = vmul.f32 %v2075_v25, %v690_v8 }
 0x15a   : > { %v714_v30 = vmul.f32 %v1836_v27, %v706_v26 }
 0x15b   : > { %v2077_v28 = vpop.eup %2076 }
 0x15c   : > { %v707_v29 = vmul.f32 %v2077_v28, %v691_v12  ;;  %v2335_v33 = vadd.f32 %v1837_v31, %v714_v30 }
 0x15e   : > { %v715_v32 = vmul.f32 %v1836_v27, %v707_v29 }
 0x160   : > { %v2337_v34 = vadd.f32 %v1837_v31, %v715_v32 }
 0x162   : > { %v724_v35 = vpack.c.bf16 %v2337_v34, %v2335_v33 }
 0x164   : > { %1933 = vmatmul.mubr.msk.bf16.vlgmr.msra.gmra.mrb[0].mxu0 %vm680_vm1, %v724_v35 }
 0x165   : > { %1938 = vmatprep.mubr.msk.bf16.mxu0 %vm2143_vm2, %v2142_v17 }
 0x237   : > { %v778_v36 = vpop.f32.mrb[0].mxu0 }
 0x238   : > { %v786_v37 = vmul.f32 0.25, %v778_v36  ;;  %v1934_v38 = vpop.f32.mrb[1].mxu0  ;;  %v2346_v47 = vpack.c.bf16 %v778_v36, %v778_v36 }
 0x239   : > { %v781_v39 = vpop.f32.mrb[2].mxu0 }
 0x23a   : > { %v1889_v40 = vpack.c.bf16 %v786_v37, %v786_v37  ;;  %v787_v41 = vmul.f32 0.25, %v781_v39  ;;  %v1935_v42 = vpop.f32.mrb[3].mxu0  ;;  %v2354_v49 = vpack.c.bf16 %v781_v39, %v781_v39 }
 0x23c   : > { %v1890_v43 = vpack.c.bf16 %v787_v41, %v787_v41  ;;  %803 = vrot.lane.b32.xlu0 %v1889_v40, %s2144_s25 }
 0x23e   : > { %853 = vrot.lane.b32.xlu1 %v1890_v43, %s2144_s25 }
 0x2ae   : > { %v804_v44 = vpop.permute.xlu0 %803 }
 0x2af   : > { %v810_v45 = vsel %vm805_vm3, %v804_v44, 0 }
 0x2b0   : > { %1937 = vmatpush3.bf16.xpose.msra.mxu0 %v810_v45  ;;  %v854_v46 = vpop.permute.xlu1 %853 }
 0x2b1   : > { %1942 = vmatprep.subr.bf16.mxu0 %v2142_v17  ;;  %v859_v48 = vsel %vm805_vm3, %v854_v46, 0 }
 0x2b7   : > { %1939 = vmatmul.mubr.msk.bf16.vlgmr.msra.gmra.mrb[4].mxu0 %vm805_vm3, %v2346_v47 }
 0x2b8   : > { %1943 = vmatpush3.bf16.xpose.msra.mxu0 %v859_v48  ;;  %1944 = vmatprep.mubr.msk.bf16.mxu0 %vm2143_vm2, %v2142_v17 }
 0x2b9   : > { %1954 = vmatprep.subr.bf16.mxu0 %v2142_v17 }
 0x2bf   : > { %1945 = vmatmul.mubr.msk.bf16.vlgmr.msra.gmra.mrb[8].mxu0 %vm805_vm3, %v2354_v49 }
 0x2c0   : > { %1956 = vmatprep.mubr.msk.bf16.mxu0 %vm2143_vm2, %v2142_v17 }
 0x38a   : > { %v846_v53 = vpop.f32.mrb[4].mxu0 }
 0x38b   : > { %v901_v54 = vsel %vm793_vm4, %v846_v53, -inf  ;;  %v1940_v55 = vpop.f32.mrb[5].mxu0 }
 0x38c   : > { %v849_v56 = vpop.f32.mrb[6].mxu0  ;;  %v904_v57 = vsel %vm903_vm5, %v901_v54, -inf }
 0x38d   : > { %905 = vmax.xlane.f32.xlu1 %v904_v57  ;;  %v1941_v58 = vpop.f32.mrb[7].mxu0 }
 0x392   : > { %v895_v59 = vpop.f32.mrb[8].mxu0 }
 0x393   : > { %v902_v60 = vsel %vm793_vm4, %v895_v59, -inf  ;;  %v1946_v61 = vpop.f32.mrb[9].mxu0 }
 0x394   : > { %v898_v62 = vpop.f32.mrb[10].mxu0  ;;  %v907_v63 = vsel %vm903_vm5, %v902_v60, -inf }
 0x395   : > { %908 = vmax.xlane.f32.xlu0 %v907_v63  ;;  %v1947_v0 = vpop.f32.mrb[11].mxu0 }
 0x39e   : > { %977 = vrot.lane.b32.xlu1 %v2354_v49, %s2145_s26 }
 0x3a2   : > { %1027 = vrot.lane.b32.xlu1 %v1889_v40, %s2146_s12 }
 0x41a   : > { %v906_v1 = vpop.xlane.xlu1 %905 }
 0x41b   : > { %v910_v2 = vsub.f32 %v901_v54, %v906_v1 }
 0x41d   : > { %v912_v3 = vmul.f32 1.442695, %v910_v2 }
 0x41e   : > { %v978_v4 = vpop.permute.xlu1 %977 }
 0x41f   : > { %2078 = vpow2.f32 %v912_v3  ;;  %v983_v5 = vsel %vm933_vm6, %v978_v4, 0 }
 0x420   : > { %1955 = vmatpush3.bf16.msra.mxu0 %v983_v5 }
 0x421   : > { %1966 = vmatprep.subr.bf16.mxu0 %v2142_v17 }
 0x422   : > { %v909_v6 = vpop.xlane.xlu0 %908  ;;  %v1028_v14 = vpop.permute.xlu1 %1027 }
 0x423   : > { %v911_v7 = vsub.f32 %v902_v60, %v909_v6  ;;  %v1033_v22 = vsel %vm805_vm3, %v1028_v14, 0 }
 0x425   : > { %v914_v8 = vmul.f32 1.442695, %v911_v7 }
 0x427   : > { %2080 = vpow2.f32 %v914_v8 }
 0x429   : > { %v2079_v9 = vpop.eup %2078 }
 0x42a   : > { %v916_v10 = vsel %vm903_vm5, %v2079_v9, 0.0 }
 0x42b   : > { %917 = vadd.xlane.f32.xlu0 %v916_v10  ;;  %v2062_v10 = vld [vmem:[%s2267_s18] sm:$0xff]  }
 0x431   : > { %v2081_v11 = vpop.eup %2080 }
 0x432   : > { %v919_v12 = vsel %vm903_vm5, %v2081_v11, 0.0 }
 0x433   : > { %920 = vadd.xlane.f32.xlu1 %v919_v12 }
 0x441   : > { %928 = vrot.lane.b32.xlu0 %v2346_v47, %s2145_s26 }
 0x444   : > { %1077 = vrot.lane.b32.xlu1 %v1890_v43, %s2146_s12 }
 0x445   : > { %1025 = vrot.lane.b32.xlu0 %v2346_v47, %s2147_s24 }
 0x448   : > { %1075 = vrot.lane.b32.xlu1 %v2354_v49, %s2147_s24 }
 0x4b8   : > { %v918_v13 = vpop.xlane.xlu0 %917 }
 0x4b9   : > { %2082 = vrcp.f32 %v918_v13 }
 0x4bc   : > { %v929_v15 = vpop.permute.xlu0 %928 }
 0x4bd   : > { %v935_v16 = vsel %vm933_vm6, %v929_v15, 0 }
 0x4be   : > { %1949 = vmatpush3.bf16.msra.mxu1 %v935_v16 }
 0x4bf   : > { %1960 = vmatprep.subr.bf16.mxu1 %v2142_v17 }
 0x4c0   : > { %v921_v18 = vpop.xlane.xlu1 %920  ;;  %v1026_v27 = vpop.permute.xlu0 %1025 }
 0x4c1   : > { %2084 = vrcp.f32 %v921_v18 }
 0x4c3   : > { %v2083_v19 = vpop.eup %2082 }
 0x4c4   : > { %v923_v20 = vmul.f32 %v2083_v19, %v2079_v9  ;;  %v1078_v25 = vpop.permute.xlu1 %1077 }
 0x4c5   : > { %v1083_v28 = vsel %vm805_vm3, %v1078_v25, 0 }
 0x4c6   : > { %v926_v21 = vpack.c.bf16 %v923_v20, %v923_v20 }
 0x4c8   : > { %1951 = vmatmul.mubr.msk.bf16.vlgmr.msra.gmra.mrb[0].mxu1 %vm903_vm5, %v926_v21  ;;  %v1076_v29 = vpop.permute.xlu1 %1075 }
 0x4c9   : > { %1961 = vmatpush3.bf16.xpose.msra.mxu1 %v1033_v22  ;;  %1962 = vmatprep.mubr.msk.bf16.mxu1 %vm2143_vm2, %v2142_v17 }
 0x4ca   : > { %1972 = vmatprep.subr.bf16.mxu1 %v2142_v17 }
 0x4cb   : > { %v2085_v23 = vpop.eup %2084 }
 0x4cc   : > { %v925_v24 = vmul.f32 %v2085_v23, %v2081_v11  ;;  %v2063_v11 = vld [vmem:[%s2267_s18 + $0x8] sm:$0xff]  }
 0x4ce   : > { %v927_v26 = vpack.c.bf16 %v925_v24, %v925_v24 }
 0x4d0   : > { %1957 = vmatmul.mubr.msk.bf16.vlgmr.msra.gmra.mrb[12].mxu0 %vm903_vm5, %v927_v26  ;;  %1963 = vmatmul.mubr.msk.bf16.vlgmr.msra.gmra.mrb[4].mxu1 %vm805_vm3, %v1026_v27 }
 0x4d1   : > { %1967 = vmatpush3.bf16.xpose.msra.mxu0 %v1083_v28  ;;  %1968 = vmatprep.mubr.msk.bf16.mxu0 %vm2143_vm2, %v2142_v17  ;;  %v1853_v28 = vld [vmem:[%s2569_s30] ss:$0 sm:$0xff]  ;;  %s2572_s30 = sld [smem:[#allocation11_spill]] (!%p1872_p5) }
 0x4d2   : > { %1978 = vmatprep.subr.bf16.mxu0 %v2142_v17  ;;  %1974 = vmatprep.mubr.msk.bf16.mxu1 %vm2143_vm2, %v2142_v17 }
 0x4d8   : > { %1969 = vmatmul.mubr.msk.bf16.vlgmr.msra.gmra.mrb[16].mxu0 %vm805_vm3, %v1076_v29 }
 0x4d9   : > { %1980 = vmatprep.mubr.msk.bf16.mxu0 %vm2143_vm2, %v2142_v17 }
 0x59b   : > { %v2400_v30 = vpop.f32.mrb[0].mxu1 }
 0x59c   : > { %v1952_v31 = vpop.f32.mrb[1].mxu1 }
 0x59d   : > { %v974_v32 = vpop.f32.mrb[2].mxu1 }
 0x59e   : > { %v1953_v35 = vpop.f32.mrb[3].mxu1 }
 0x5a3   : > { %v2402_v36 = vpop.f32.mrb[12].mxu0  ;;  %v1069_v37 = vpop.f32.mrb[4].mxu1 }
 0x5a4   : > { %v1125_v38 = vsel %vm793_vm4, %v1069_v37, -inf  ;;  %v1958_v39 = vpop.f32.mrb[13].mxu0  ;;  %v1964_v40 = vpop.f32.mrb[5].mxu1 }
 0x5a5   : > { %v1022_v41 = vpop.f32.mrb[14].mxu0  ;;  %v1072_v42 = vpop.f32.mrb[6].mxu1  ;;  %v1127_v43 = vsel %vm903_vm5, %v1125_v38, -inf }
 0x5a6   : > { %1128 = vmax.xlane.f32.xlu0 %v1127_v43  ;;  %v1959_v44 = vpop.f32.mrb[15].mxu0  ;;  %v1965_v45 = vpop.f32.mrb[7].mxu1 }
 0x5ab   : > { %v1119_v46 = vpop.f32.mrb[16].mxu0 }
 0x5ac   : > { %v1126_v48 = vsel %vm793_vm4, %v1119_v46, -inf  ;;  %v1970_v50 = vpop.f32.mrb[17].mxu0 }
 0x5ad   : > { %v1122_v53 = vpop.f32.mrb[18].mxu0  ;;  %v1130_v54 = vsel %vm903_vm5, %v1126_v48, -inf }
 0x5ae   : > { %1131 = vmax.xlane.f32.xlu1 %v1130_v54  ;;  %v1971_v55 = vpop.f32.mrb[19].mxu0  ;;  %v2064_v53 = vld [vmem:[%s2288_s17] sm:$0xff]   ;;  %v2065_v54 = vld [vmem:[%s2288_s17 + $0x8] sm:$0xff]  }
 0x5af   : > { %v2066_v55 = vld [vmem:[%s2302_s27] sm:$0xff]  }
 0x5bf   : > { %1199 = vrot.lane.b32.xlu1 %v2354_v49, %s2148_s2 }
 0x633   : > { %v1129_v56 = vpop.xlane.xlu0 %1128 }
 0x634   : > { %v1133_v57 = vsub.f32 %v1125_v38, %v1129_v56  ;;  %v2067_v56 = vld [vmem:[%s2302_s27 + $0x8] sm:$0xff]  }
 0x636   : > { %v1135_v58 = vmul.f32 1.442695, %v1133_v57  ;;  %v2068_v57 = vld [vmem:[%s2302_s27 + $0x10] sm:$0xff]  }
 0x638   : > { %2086 = vpow2.f32 %v1135_v58  ;;  %v2069_v58 = vld [vmem:[%s2302_s27 + $0x18] sm:$0xff]  }
 0x63b   : > { %v1132_v59 = vpop.xlane.xlu1 %1131 }
 0x63c   : > { %v1134_v60 = vsub.f32 %v1126_v48, %v1132_v59  ;;  %v2070_v59 = vld [vmem:[%s2302_s27 + $0x20] sm:$0xff]  }
 0x63e   : > { %v1137_v61 = vmul.f32 1.442695, %v1134_v60  ;;  %v2071_v60 = vld [vmem:[%s2302_s27 + $0x28] sm:$0xff]  }
 0x63f   : > { %v1200_v62 = vpop.permute.xlu1 %1199 }
 0x640   : > { %2088 = vpow2.f32 %v1137_v61  ;;  %v1205_v51 = vsel %vm933_vm6, %v1200_v62, 0 }
 0x641   : > { %1979 = vmatpush3.bf16.msra.mxu0 %v1205_v51 }
 0x642   : > { %v2087_v52 = vpop.eup %2086  ;;  %1992 = vmatprep.subr.bf16.mxu0 %v2142_v17 }
 0x643   : > { %v1139_v63 = vsel %vm903_vm5, %v2087_v52, 0.0 }
 0x644   : > { %1140 = vadd.xlane.f32.xlu0 %v1139_v63 }
 0x64a   : > { %v2089_v0 = vpop.eup %2088 }
 0x64b   : > { %v1142_v49 = vsel %vm903_vm5, %v2089_v0, 0.0 }
 0x64c   : > { %1143 = vadd.xlane.f32.xlu0 %v1142_v49 }
 0x662   : > { %1151 = vrot.lane.b32.xlu0 %v2346_v47, %s2148_s2 }
 0x6d1   : > { %v1141_v1 = vpop.xlane.xlu0 %1140 }
 0x6d2   : > { %2090 = vrcp.f32 %v1141_v1 }
 0x6d9   : > { %v1144_v2 = vpop.xlane.xlu0 %1143 }
 0x6da   : > { %2092 = vrcp.f32 %v1144_v2  ;;  %v1857_v2 = vld [vmem:[%s2570_s19] ss:$0 sm:$0xff]  ;;  %s2573_s19 = sld [smem:[#allocation12_spill]] (!%p1872_p5) }
 0x6dc   : > { %v2091_v3 = vpop.eup %2090 }
 0x6dd   : > { %v1146_v4 = vmul.f32 %v2091_v3, %v2087_v52  ;;  %v1152_v5 = vpop.permute.xlu0 %1151 }
 0x6de   : > { %v1157_v6 = vsel %vm933_vm6, %v1152_v5, 0 }
 0x6df   : > { %1973 = vmatpush3.bf16.msra.mxu1 %v1157_v6  ;;  %v1149_v7 = vpack.c.bf16 %v1146_v4, %v1146_v4  ;;  %v1858_v6 = vld [vmem:[%s649_s1] ss:$0 sm:$0xff] }
 0x6e0   : > { %1984 = vmatprep.subr.bf16.mxu1 %v2142_v17 }
 0x6e2   : > { %1975 = vmatmul.mubr.msk.bf16.vlgmr.msra.gmra.mrb[8].mxu1 %vm903_vm5, %v1149_v7 }
 0x6e3   : > { %1988 = vmatprep.mubr.msk.bf16.mxu1 %vm2143_vm2, %v2142_v17  ;;  %1985 = vmatpush3.bf16.msra.mxu1 %v2062_v10  ;;  %v2072_v10 = vld [vmem:[%s2302_s27 + $0x30] sm:$0xff]  }
 0x6e4   : > { %v2093_v47 = vpop.eup %2092  ;;  %1986 = vmatprep.subr.bf16.mxu1 %v2142_v17 }
 0x6e5   : > { %v1148_v8 = vmul.f32 %v2093_v47, %v2089_v0 }
 0x6e7   : > { %v1150_v9 = vpack.c.bf16 %v1148_v8, %v1148_v8  ;;  %1987 = vmatpush3.bf16.msra.mxu1 %v2063_v11  ;;  %v2073_v11 = vld [vmem:[%s2302_s27 + $0x38] sm:$0xff]  }
 0x6e8   : > { %2000 = vmatprep.subr.bf16.mxu1 %v2142_v17 }
 0x6e9   : > { %1981 = vmatmul.mubr.msk.bf16.vlgmr.msra.gmra.mrb[20].mxu0 %vm903_vm5, %v1150_v9 }
 0x6ea   : > { %1996 = vmatprep.mubr.msk.bf16.mxu0 %vm2143_vm2, %v2142_v17  ;;  %1993 = vmatpush3.bf16.msra.mxu0 %v2064_v53 }
 0x6eb   : > { %1994 = vmatprep.subr.bf16.mxu0 %v2142_v17 }
 0x6ee   : > { %1995 = vmatpush3.bf16.msra.mxu0 %v2065_v54 }
 0x7b5   : > { %v1193_v12 = vpop.f32.mrb[8].mxu1 }
 0x7b6   : > { %v1976_v13 = vpop.f32.mrb[9].mxu1 }
 0x7b7   : > { %v1196_v14 = vpop.f32.mrb[10].mxu1 }
 0x7b8   : > { %v1977_v15 = vpop.f32.mrb[11].mxu1 }
 0x7bc   : > { %v1241_v16 = vpop.f32.mrb[20].mxu0 }
 0x7bd   : > { %v2055_v18 = vpack.i.bf16 %v1241_v16, %v1193_v12  ;;  %v1982_v19 = vpop.f32.mrb[21].mxu0  ;;  %v1859_v12 = vld [vmem:[%s657_s20] ss:$0 sm:$0xff] }
 0x7be   : > { %v1244_v20 = vpop.f32.mrb[22].mxu0 }
 0x7bf   : > { %2056 = vrot.lane.b32.xlu1 %v2055_v18, %s2149_s29  ;;  %v1983_v21 = vpop.f32.mrb[23].mxu0  ;;  %s2571_s29 = sld [smem:[#allocation10_spill]] (!%p1872_p5) }
 0x831   : > { %v2057_v22 = vpop.permute.xlu1 %2056 }
 0x832   : > { %v2059_v23 = vunpack.i.h.bf16 %v2057_v22  ;;  %v2058_v24 = vunpack.i.l.bf16 %v2057_v22 }
 0x834   : > { %v1256_v25 = vsel %vm805_vm3, %v2402_v36, %v2059_v23  ;;  %v1255_v26 = vsel %vm805_vm3, %v2400_v30, %v2058_v24 }
 0x835   : > { %v1257_v27 = vpack.c.bf16 %v1256_v25, %v1255_v26 }
 0x837   : > { %1989 = vmatmul.mubr.msk.bf16.vlgmr.msra.gmra.mrb[12].mxu1 %vm680_vm1, %v1257_v27 }
 0x838   : > { %2016 = vmatprep.mubr.msk.bf16.mxu1 %vm2143_vm2, %v2142_v17  ;;  %2001 = vmatpush3.bf16.msra.mxu1 %v2066_v55 }
 0x839   : > { %2002 = vmatprep.subr.bf16.mxu1 %v2142_v17 }
 0x83c   : > { %2003 = vmatpush3.bf16.msra.mxu1 %v2067_v56 }
 0x83d   : > { %2004 = vmatprep.subr.bf16.mxu1 %v2142_v17 }
 0x840   : > { %2005 = vmatpush3.bf16.msra.mxu1 %v2068_v57 }
 0x841   : > { %2006 = vmatprep.subr.bf16.mxu1 %v2142_v17 }
 0x844   : > { %2007 = vmatpush3.bf16.msra.mxu1 %v2069_v58  ;;  %v1873_v58 = vld [vmem:[%s2571_s29] ss:$0 sm:$0xff] (!%p1872_p5) }
 0x845   : > { %2008 = vmatprep.subr.bf16.mxu1 %v2142_v17 }
 0x848   : > { %2009 = vmatpush3.bf16.msra.mxu1 %v2070_v59 }
 0x849   : > { %2010 = vmatprep.subr.bf16.mxu1 %v2142_v17 }
 0x84c   : > { %2011 = vmatpush3.bf16.msra.mxu1 %v2071_v60 }
 0x84d   : > { %2012 = vmatprep.subr.bf16.mxu1 %v2142_v17 }
 0x850   : > { %2013 = vmatpush3.bf16.msra.mxu1 %v2072_v10 }
 0x851   : > { %2014 = vmatprep.subr.bf16.mxu1 %v2142_v17  ;;  %v1863_v17 = vld [vmem:[%s665_s13] ss:$0 sm:$0xff] }
 0x854   : > { %2015 = vmatpush3.bf16.msra.mxu1 %v2073_v11 }
 0x90a   : > { %v1318_v29 = vpop.f32.mrb[12].mxu1 }
 0x90b   : > { %v1319_v31 = vadd.f32 %v1853_v28, %v1318_v29  ;;  %v1990_v32 = vpop.f32.mrb[13].mxu1 }
 0x90c   : > { %v1321_v35 = vpop.f32.mrb[14].mxu1 }
 0x90d   : > { %v1322_v37 = vadd.f32 %v1853_v28, %v1321_v35  ;;  %v1991_v36 = vpop.f32.mrb[15].mxu1  ;;  %v1325_v38 = vadd.f32 %v1319_v31, %v2335_v33 }
 0x90f   : > { %v1329_v30 = vsel %vm680_vm1, %v1325_v38, 0.0  ;;  %v1326_v39 = vadd.f32 %v1322_v37, %v2337_v34 }
 0x910   : > { %1330 = vadd.xlane.f32.xlu1 %v1329_v30 }
 0x911   : > { %v1332_v40 = vsel %vm680_vm1, %v1326_v39, 0.0 }
 0x912   : > { %1333 = vadd.xlane.f32.xlu0 %v1332_v40 }
 0x99d   : > { %v1331_v41 = vpop.xlane.xlu1 %1330 }
 0x99e   : > { %v1335_v42 = vmul.f32 0.03125, %v1331_v41 }
 0x99f   : > { %v1334_v43 = vpop.xlane.xlu0 %1333 }
 0x9a0   : > { %v1337_v44 = vsub.f32 %v1325_v38, %v1335_v42  ;;  %v1336_v45 = vmul.f32 0.03125, %v1334_v43 }
 0x9a2   : > { %v1338_v46 = vsub.f32 %v1326_v39, %v1336_v45  ;;  %v1339_v48 = vmul.f32 %v1337_v44, %v1337_v44  ;;  %v2098_v45 = vld [vmem:[%s2550_s14] sm:$0xff] (!%p1872_p5)  }
 0x9a4   : > { %v1341_v33 = vsel %vm680_vm1, %v1339_v48, 0.0  ;;  %v1340_v50 = vmul.f32 %v1338_v46, %v1338_v46  ;;  %v2099_v48 = vld [vmem:[%s2550_s14 + $0x8] sm:$0xff] (!%p1872_p5)  }
 0x9a5   : > { %1342 = vadd.xlane.f32.xlu0 %v1341_v33 }
 0x9a6   : > { %v1344_v34 = vsel %vm680_vm1, %v1340_v50, 0.0 }
 0x9a9   : > { %1345 = vadd.xlane.f32.xlu0 %v1344_v34 }
 0xa32   : > { %v1343_v61 = vpop.xlane.xlu0 %1342 }
 0xa33   : > { %v1347_v62 = vmul.f32 0.03125, %v1343_v61 }
 0xa35   : > { %v1349_v51 = vadd.f32 1e-05, %v1347_v62  ;;  %v1874_v62 = vld [vmem:[%s2572_s30] ss:$0 sm:$0xff] (!%p1872_p5) }
 0xa36   : > { %v1346_v52 = vpop.xlane.xlu0 %1345 }
 0xa37   : > { %2094 = vrsqrt.f32 %v1349_v51  ;;  %v1348_v63 = vmul.f32 0.03125, %v1346_v52 }
 0xa39   : > { %v1350_v0 = vadd.f32 1e-05, %v1348_v63 }
 0xa3b   : > { %2096 = vrsqrt.f32 %v1350_v0 }
 0xa41   : > { %v2095_v49 = vpop.eup %2094 }
 0xa42   : > { %v1353_v1 = vmul.f32 %v2095_v49, %v1337_v44  ;;  %v1875_v49 = vld [vmem:[%s2573_s19] ss:$0 sm:$0xff] (!%p1872_p5) }
 0xa44   : > { %v1361_v4 = vmul.f32 %v1857_v2, %v1353_v1 }
 0xa45   : > { %v2097_v3 = vpop.eup %2096 }
 0xa46   : > { %v1354_v5 = vmul.f32 %v2097_v3, %v1338_v46  ;;  %v1369_v47 = vadd.f32 %v1858_v6, %v1361_v4  ;;  %v2150_v46 = vmov (!%p1872_p5), 0.0  }
 0xa47   : > { %2020 = vmatprep.subr.bf16.mxu0 (!%p1872_p5), %v2150_v46 }
 0xa48   : > { %v1362_v7 = vmul.f32 %v1857_v2, %v1354_v5 }
 0xa4a   : > { %v1370_v8 = vadd.f32 %v1858_v6, %v1362_v7 }
 0xa4c   : > { %v1371_v9 = vpack.c.bf16 %v1370_v8, %v1369_v47 }
 0xa4e   : > { %1997 = vmatmul.mubr.msk.bf16.vlgmr.msra.gmra.mrb[24].mxu0 %vm680_vm1, %v1371_v9 }
 0xa4f   : > { %2024 = vmatprep.mubr.msk.bf16.mxu0 (!%p1872_p5), %vm2151_vm7, %v2150_v46  ;;  %2021 = vmatpush3.bf16.msra.mxu0 (!%p1872_p5), %v2098_v45 }
 0xa50   : > { %2022 = vmatprep.subr.bf16.mxu0 (!%p1872_p5), %v2150_v46 }
 0xa53   : > { %2023 = vmatpush3.bf16.msra.mxu0 (!%p1872_p5), %v2099_v48 }
 0xb21   : > { %v1432_v13 = vpop.f32.mrb[24].mxu0 }
 0xb22   : > { %v1433_v14 = vadd.f32 %v1859_v12, %v1432_v13  ;;  %v1998_v15 = vpop.f32.mrb[25].mxu0 }
 0xb23   : > { %v1435_v16 = vpop.f32.mrb[26].mxu0 }
 0xb24   : > { %v1436_v18 = vadd.f32 %v1859_v12, %v1435_v16  ;;  %v1999_v19 = vpop.f32.mrb[27].mxu0  ;;  %v1439_v20 = vmax.f32 %v1433_v14, 0.0 }
 0xb26   : > { %v1440_v21 = vmax.f32 %v1436_v18, 0.0 }
 0xb28   : > { %v1441_v22 = vpack.c.bf16 %v1440_v21, %v1439_v20 }
 0xb2a   : > { %2017 = vmatmul.mubr.bf16.vlgmr.msra.gmra.mrb[16].mxu1 %v1441_v22 }
 0xbfd   : > { %v1547_v23 = vpop.f32.mrb[16].mxu1 }
 0xbfe   : > { %v1548_v24 = vadd.f32 %v1863_v17, %v1547_v23  ;;  %v2018_v25 = vpop.f32.mrb[17].mxu1  ;;  %1561 = sbr.rel (%p1872_p5) target bundleno = 3610 (0xe1a), region = 92 }
 0xbff   : > { %v1550_v26 = vpop.f32.mrb[18].mxu1 }
 0xc00   : > { %v1554_v27 = vadd.f32 %v1548_v24, %v1369_v47  ;;  %v1551_v28 = vadd.f32 %v1863_v17, %v1550_v26  ;;  %v2019_v29 = vpop.f32.mrb[19].mxu1 }
 0xc02   : > { %1556 = vst.msk [vmem:[#allocation2] sm:$0xff] %vm680_vm1, %v1554_v27  ;;  %v1555_v31 = vadd.f32 %v1551_v28, %v1370_v8  ;;  %v1564_v32 = vsel (!%p1872_p5), %vm680_vm1, %v1554_v27, 0.0 }
 0xc03   : > { %1565 = vadd.xlane.f32.xlu0 (!%p1872_p5), %v1564_v32 }
 0xc04   : > { %1557 = vst.msk [vmem:[#allocation2 + $0x8] sm:$0xff] %vm680_vm1, %v1555_v31  ;;  %v1567_v35 = vsel (!%p1872_p5), %vm680_vm1, %v1555_v31, 0.0 }
 0xc07   : > { %1568 = vadd.xlane.f32.xlu0 %v1567_v35 }
 0xc90   : > { %v1566_v37 = vpop.xlane.xlu0 %1565 }
 0xc91   : > { %v1570_v36 = vmul.f32 0.03125, %v1566_v37 }
 0xc93   : > { %v1572_v38 = vsub.f32 %v1554_v27, %v1570_v36 }
 0xc94   : > { %v1569_v30 = vpop.xlane.xlu0 %1568 }
 0xc95   : > { %v1571_v39 = vmul.f32 0.03125, %v1569_v30  ;;  %v1574_v40 = vmul.f32 %v1572_v38, %v1572_v38 }
 0xc97   : > { %v1573_v41 = vsub.f32 %v1555_v31, %v1571_v39  ;;  %v1576_v42 = vsel %vm680_vm1, %v1574_v40, 0.0 }
 0xc98   : > { %1577 = vadd.xlane.f32.xlu1 %v1576_v42 }
 0xc99   : > { %v1575_v43 = vmul.f32 %v1573_v41, %v1573_v41 }
 0xc9b   : > { %v1579_v44 = vsel %vm680_vm1, %v1575_v43, 0.0 }
 0xc9c   : > { %1580 = vadd.xlane.f32.xlu1 %v1579_v44 }
 0xd25   : > { %v1578_v33 = vpop.xlane.xlu1 %1577 }
 0xd26   : > { %v1582_v50 = vmul.f32 0.03125, %v1578_v33 }
 0xd28   : > { %v1584_v34 = vadd.f32 1e-05, %v1582_v50 }
 0xd29   : > { %v1581_v53 = vpop.xlane.xlu1 %1580 }
 0xd2a   : > { %2100 = vrsqrt.f32 %v1584_v34  ;;  %v1583_v54 = vmul.f32 0.03125, %v1581_v53 }
 0xd2c   : > { %v1585_v55 = vadd.f32 1e-05, %v1583_v54 }
 0xd2e   : > { %2102 = vrsqrt.f32 %v1585_v55 }
 0xd34   : > { %v2101_v56 = vpop.eup %2100 }
 0xd35   : > { %v1588_v57 = vmul.f32 %v2101_v56, %v1572_v38 }
 0xd37   : > { %v1596_v61 = vmul.f32 %v1873_v58, %v1588_v57 }
 0xd38   : > { %v2103_v59 = vpop.eup %2102 }
 0xd39   : > { %v1589_v60 = vmul.f32 %v2103_v59, %v1573_v41  ;;  %v1604_v52 = vadd.f32 %v1874_v62, %v1596_v61 }
 0xd3b   : > { %v1597_v51 = vmul.f32 %v1873_v58, %v1589_v60 }
 0xd3d   : > { %v1605_v63 = vadd.f32 %v1874_v62, %v1597_v51 }
 0xd3f   : > { %v1606_v0 = vpack.c.bf16 %v1605_v63, %v1604_v52 }
 0xd41   : > { %2025 = vmatmul.mubr.msk.bf16.vlgmr.msra.gmra.mrb[0].mxu0 %vm680_vm1, %v1606_v0 }
 0xe14   : > { %v1667_v1 = vpop.f32.mrb[0].mxu0 }
 0xe15   : > { %v1668_v2 = vadd.f32 %v1875_v49, %v1667_v1  ;;  %v2026_v3 = vpop.f32.mrb[1].mxu0 }
 0xe16   : > { %v1670_v4 = vpop.f32.mrb[2].mxu0 }
 0xe17   : > { %1674 = vst [vmem:[#allocation3] sm:$0xff] %v1668_v2  ;;  %v1671_v5 = vadd.f32 %v1875_v49, %v1670_v4  ;;  %v2027_v6 = vpop.f32.mrb[3].mxu0 }
 0xe19   : > { %1675 = vst [vmem:[#allocation3 + $0x8] sm:$0xff] %v1671_v5 }
 0xe1a PF: > { %p2032_p6 = scmp.eq.s32.totalorder %s2246_s22, 1  ;;  %s2152_s15 = smov [#allocation3]  }
 0xe1b   : > { %s1682_s16 = sshll.u32 %s2152_s15, 4  ;;  %s1683_s16 = int_to_ptr.vmem [resolvable:$true] %s1682_s16 }
 0xe1c   : > { %s2104_s25 = scalar_lea.vmem %s1683_s16, 256  ;;  %p2111_p10 = scmp.lt.s32.totalorder %s1683_s16, %s1683_s16 }
 0xe1d   : > { %p2105_p7 = scmp.ne.s32.totalorder %s1683_s16, %s2104_s25  ;;  %p2112_p11 = scmp.lt.s32.totalorder %s2104_s25, %s2104_s25 }
 0xe1f   : > { %p2106_p8 = pnand %p2105_p7, %p2032_p6  ;;  %p2113_p12 = por %p2112_p11, %p2111_p10 }
 0xe21   : > { %p2107_p9 = pneg %p2106_p8 }
 0xe23   : > { %p2114_p13 = pnand %p2113_p12, %p2107_p9 }
 0xe25   : > { %2117 = shalt.err (!%p2114_p13)
}
 0xe26   : > { %s2574_s12 = sld [smem:[#allocation13_spill]] }
 0xe2c   : > { %s2118_s13 = scalar_lea.hbm %s2574_s12, 256 }
 0xe2d   : > { %p2119_p0 = scmp.ne.s32.totalorder %s2574_s12, %s2118_s13  ;;  %p2124_p3 = scmp.lt.u32.totalorder %s2118_s13, %s2574_s12 }
 0xe2f   : > { %p2120_p1 = pnand %p2119_p0, %p2032_p6 }
 0xe31   : > { %p2121_p2 = pneg %p2120_p1 }
 0xe33   : > { %p2126_p4 = pnand %p2124_p3, %p2121_p2 }
 0xe35   : > { %2129 = shalt.err (!%p2126_p4)
}
 0xe36   : > { %s2153_s2 = smov 128   ;;  %s2154_s29 = smov 8  }
 0xe37   : > { %2029 = dma.vmem_to_hbm [thread:$0]  (%p2032_p6), %s1683_s16, 256, %s2574_s12, [#allocation4], %s2153_s2, %s2153_s2, %s2154_s29  }
 0xe38   : > { %2135 = dma.done.wait (%p2032_p6), [#allocation4], 256  }
 0xe39   : > { %2137 = vsyncadd (%p2032_p6), [#allocation4], 4294967040 }
 0xe3a PF: > { %s2575_s30 = sld [smem:[#allocation6_spill]] }
 0xe40   : > { %s27_s21 = sadd.s32 1, %s2575_s30  }
 0xe41   : > { %p24_p5 = scmp.ge.s32.totalorder %s27_s21, 4  }
 0xe43   :  { %26 = sbr.rel (!%p24_p5) target bundleno = 9 (0x9), region = 149 }
 0xe4a   :  { %1698 = vsyncpa [#allocation4], 1 }
 0xe4b   :  { %1700 = vsyncpa [#allocation4 + $0x1], 1 }

</bundles_post_ra>
